<compile_context>
chip_gen: v7x
topology: tpu7x:2x2x1
jax: 0.10.0
libtpu: 0.0.40
codegen_flags: <defaults>
</compile_context>

<pallas_src>
import jax
import jax.numpy as jnp
from jax.experimental import pallas as pl
from jax.experimental.pallas import tpu as pltpu

LANE = 128                      # feature-dim pad granularity (use 256 on v6e/v7x if dims approach it)
VMEM_LIMIT = 32 * 1024 * 1024   # raises v5e's 16 MiB scoped default; fits v7x's 64 MiB physical


def _round_up(x, m):
    return ((x + m - 1) // m) * m


def _pad_to(a, axis, mult):
    pad = _round_up(a.shape[axis], mult) - a.shape[axis]
    if pad == 0:
        return a
    widths = [(0, 0)] * a.ndim
    widths[axis] = (0, pad)
    return jnp.pad(a, widths)


def _cparams(sem):
    return pltpu.CompilerParams(dimension_semantics=sem,
                                vmem_limit_bytes=VMEM_LIMIT)


# ------------------------------ Pallas kernels ------------------------------

def _edge_msg_kernel(h_ref, r_ref, n_ref, w_ref, o_ref):
    # Fused: composition (opn='mult') -> MXU matmul -> edge_norm * (1/3) scale.
    # h/r are bf16; the VPU multiply hides under the MXU push.
    data = h_ref[...] * r_ref[...]
    acc = jnp.dot(data, w_ref[...], preferred_element_type=jnp.float32)
    o_ref[...] = acc * (n_ref[...] * (1.0 / 3.0))


def edge_message_matmul(h_src, edge_rel, edge_norm, w_in, w_out, tile_m=512):
    """Fused half-edge GEMMs: first half through w_in, second through w_out, with
    composition + norm*(1/3) done in-kernel.  Grid over (half, M-tiles)."""
    e2, K = h_src.shape
    half = e2 // 2
    N = w_in.shape[1]
    tile_m = min(tile_m, _round_up(half, 8))
    half_pad = _round_up(half, tile_m)

    def split_pad(a):
        a = a.reshape(2, half, *a.shape[1:])
        widths = [(0, 0), (0, half_pad - half)] + [(0, 0)] * (a.ndim - 2)
        return jnp.pad(a, widths)

    h = split_pad(h_src)                                           # [2, half_pad, K] bf16
    r = split_pad(edge_rel)                                        # [2, half_pad, K] bf16
    n = split_pad(edge_norm.reshape(e2, 1).astype(jnp.float32))    # [2, half_pad, 1]
    w = jnp.stack([w_in, w_out], axis=0)                           # [2, K, N] bf16

    out = pl.pallas_call(
        _edge_msg_kernel,
        out_shape=jax.ShapeDtypeStruct((2, half_pad, N), jnp.float32),
        grid=(2, half_pad // tile_m),
        in_specs=[pl.BlockSpec((None, tile_m, K), lambda hh, i: (hh, i, 0)),
                  pl.BlockSpec((None, tile_m, K), lambda hh, i: (hh, i, 0)),
                  pl.BlockSpec((None, tile_m, 1), lambda hh, i: (hh, i, 0)),
                  pl.BlockSpec((None, K, N), lambda hh, i: (hh, 0, 0))],
        out_specs=pl.BlockSpec((None, tile_m, N), lambda hh, i: (hh, i, 0)),
        compiler_params=_cparams(("parallel", "parallel")),
    )(h, r, n, w)
    return out[:, :half, :].reshape(2 * half, N)


def _loop_mm_kernel(a_ref, b_ref, bias_ref, o_ref):
    # Self-loop GEMM with the conv bias fused into the store (saves an HBM pass).
    o_ref[...] = (jnp.dot(a_ref[...], b_ref[...],
                          preferred_element_type=jnp.float32) + bias_ref[...])


def self_loop_matmul(a, b, bias, tile_m=512):
    """a[M,K](bf16) @ b[K,N](bf16) + bias[N] -> [M,N] f32, tiled over M."""
    M, K = a.shape
    K2, N = b.shape
    assert K == K2
    tile_m = min(tile_m, _round_up(M, 8))
    m_pad = _round_up(M, tile_m)
    a_p = jnp.pad(a, ((0, m_pad - M), (0, 0)))
    out = pl.pallas_call(
        _loop_mm_kernel,
        out_shape=jax.ShapeDtypeStruct((m_pad, N), jnp.float32),
        grid=(m_pad // tile_m,),
        in_specs=[pl.BlockSpec((tile_m, K), lambda i: (i, 0)),
                  pl.BlockSpec((K, N), lambda i: (0, 0)),
                  pl.BlockSpec((1, N), lambda i: (0, 0))],
        out_specs=pl.BlockSpec((tile_m, N), lambda i: (i, 0)),
        compiler_params=_cparams(("parallel",)),
    )(a_p, b, bias.reshape(1, N).astype(jnp.float32))
    return out[:M]


def _distmult_kernel(obj_ref, ent_t_ref, bias_ref, out_ref):
    # scores = obj[B,D] @ all_ent.T[D,TN]  (bf16 inputs, f32 MXU accumulation)
    scores = jnp.dot(obj_ref[...], ent_t_ref[...],
                     preferred_element_type=jnp.float32)
    out_ref[...] = jax.nn.sigmoid(scores + bias_ref[...])


def prepare_distmult_tables(all_ent, ent_bias, tile_n=2048):
    """Build the pre-transposed bf16 [D, E_pad] entity table and padded bias row.
    Hoist this out of per-batch loops when scoring many query batches against the
    same embeddings (it is an extra full read+write of the entity matrix)."""
    E, D = all_ent.shape
    tile_n = min(tile_n, _round_up(E, 128))
    e_pad = _round_up(E, tile_n)
    ent_t = jnp.pad(all_ent.astype(jnp.bfloat16).T, ((0, 0), (0, e_pad - E)))
    bias2d = jnp.pad(ent_bias.reshape(1, E).astype(jnp.float32),
                     ((0, 0), (0, e_pad - E)))
    return ent_t, bias2d, tile_n


def distmult_score(sub_emb, rel_emb, ent_t, bias2d, num_ent, tile_n):
    """sigmoid((sub_emb * rel_emb) @ all_ent.T + ent_bias) -> [B, num_ent] f32.
    Entity (lane) axis tiled; keep e_pad//tile_n >= 2 for real sizes so the
    parallel axis can shard across v7x's two TensorCores."""
    B, D = sub_emb.shape
    e_pad = ent_t.shape[1]
    obj = (sub_emb * rel_emb).astype(jnp.bfloat16)
    out = pl.pallas_call(
        _distmult_kernel,
        out_shape=jax.ShapeDtypeStruct((B, e_pad), jnp.float32),
        grid=(e_pad // tile_n,),
        in_specs=[pl.BlockSpec((B, D), lambda j: (0, 0)),
                  pl.BlockSpec((D, tile_n), lambda j: (0, j)),
                  pl.BlockSpec((1, tile_n), lambda j: (0, j))],
        out_specs=pl.BlockSpec((B, tile_n), lambda j: (0, j)),
        compiler_params=_cparams(("parallel",)),
    )(obj, ent_t, bias2d)
    return out[:, :num_ent]


# --------------------------- parameter preparation ---------------------------

def prepare_conv_params(p):
    """Pad feature dims to LANE multiples (zero pad is math-transparent through the
    layer: pad columns stay exactly 0 through messages / BN / tanh), cast GEMM
    weights to bf16, and fold loop_rel and the 1/3 scale into w_loop."""
    w_loop_eff = (p['loop_rel'].reshape(-1, 1) * p['w_loop']) / 3.0
    pad2 = lambda w: _pad_to(_pad_to(w, 0, LANE), 1, LANE)
    return {
        'w_in': pad2(p['w_in']).astype(jnp.bfloat16),
        'w_out': pad2(p['w_out']).astype(jnp.bfloat16),
        'w_loop_eff': pad2(w_loop_eff).astype(jnp.bfloat16),
        'w_rel': pad2(p['w_rel']).astype(jnp.float32),
        'bias': _pad_to(p['bias'], 0, LANE),
    }


def prepare_params(params):
    """One-time padding/folding of all model parameters (hoist out of eval loops)."""
    return {
        'init_embed': _pad_to(params['init_embed'], 1, LANE),
        'init_rel': _pad_to(params['init_rel'], 1, LANE),
        'conv1': prepare_conv_params(params['conv1']),
        'conv2': prepare_conv_params(params['conv2']),
        'bias': params['bias'],
    }


# --------------------------- CompGCN (plain-JAX glue) ------------------------

def xavier_normal(key, shape, gain):
    fan_in, fan_out = shape[0], shape[1]
    std = gain * jnp.sqrt(2.0 / (fan_in + fan_out))
    return std * jax.random.normal(key, shape, dtype=jnp.float32)


def compgcn_cov(p, x, rel_repr, src, dst, edge_type, edge_norm, num_ent):
    """One CompGCNCov layer (opn='mult', num_base<=0, dropout=0, training BN)."""
    rel = rel_repr                                  # no basis decomposition
    x_bf = x.astype(jnp.bfloat16)
    rel_bf = rel.astype(jnp.bfloat16)

    # gathers stay XLA glue
    # TODO(synk): for large graphs, replace gather + segment_sum with a sorted-by-dst
    # PrefetchScalarGridSpec accumulation kernel (random access is the real bottleneck).
    h_src = x_bf[src]                               # [2E, K]
    edge_rel = rel_bf[edge_type]                    # [2E, K]

    # composition + GEMM + edge_norm*(1/3) all fused in one pallas_call
    msg = edge_message_matmul(h_src, edge_rel, edge_norm, p['w_in'], p['w_out'])

    agg = jax.ops.segment_sum(msg, dst, num_segments=num_ent)

    # self-loop: (x*loop_rel)@w_loop/3 + bias, with loop_rel and /3 folded into w_loop_eff
    h = agg + self_loop_matmul(x_bf, p['w_loop_eff'], p['bias'])

    # BatchNorm1d, training mode (batch stats, gamma=1, beta=0), eps=1e-5
    # TODO(synk): CompGCNCov source unavailable; verify affine/eval-mode stats vs reference.
    mean = jnp.mean(h, axis=0, keepdims=True)
    var = jnp.mean((h - mean) ** 2, axis=0, keepdims=True)
    h = (h - mean) * jax.lax.rsqrt(var + 1e-5)

    x_new = jnp.tanh(h)                             # self.act = torch.tanh
    # rel update is a tiny [2*num_rel, d] @ [d, d] GEMM: plain XLA (no launch overhead)
    rel_new = jnp.dot(rel, p['w_rel'])
    return x_new, rel_new


def compgcn_distmult_forward(pparams, graph, subj, rel_idx, num_ent):
    src, dst, edge_type, edge_norm = graph
    x, r = pparams['init_embed'], pparams['init_rel']
    # layer 1
    x, r = compgcn_cov(pparams['conv1'], x, r, src, dst, edge_type, edge_norm, num_ent)
    # drop1: hid_drop = 0.0 -> identity
    # layer 2 (n_layer == 2)
    x, r = compgcn_cov(pparams['conv2'], x, r, src, dst, edge_type, edge_norm, num_ent)
    # drop2: identity
    sub_emb = x[subj]                               # index_select
    rel_emb = r[rel_idx]
    # DistMult scoring (Pallas kernel): sigmoid(obj @ x.T + bias)
    ent_t, bias2d, tile_n = prepare_distmult_tables(x, pparams['bias'])
    return distmult_score(sub_emb, rel_emb, ent_t, bias2d, num_ent, tile_n)


# ----------------------------------- main ------------------------------------

if __name__ == "__main__":
    # small, self-consistent shapes
    num_ent, num_rel, num_base = 256, 5, 0
    init_dim = gcn_dim = embed_dim = 32
    n_layer = 2
    batch = 8
    n_orig_edges = 64

    key = jax.random.PRNGKey(0)
    keys = jax.random.split(key, 16)
    gain = jnp.sqrt(2.0)                            # calculate_gain('relu')

    def conv_params(k, d_in, d_out):
        ks = jax.random.split(k, 5)
        return {
            'w_loop': xavier_normal(ks[0], (d_in, d_out), gain),
            'w_in': xavier_normal(ks[1], (d_in, d_out), gain),
            'w_out': xavier_normal(ks[2], (d_in, d_out), gain),
            'w_rel': xavier_normal(ks[3], (d_in, d_out), gain),
            'loop_rel': xavier_normal(ks[4], (1, d_in), gain),
            'bias': jnp.zeros((d_out,), jnp.float32),
        }

    params = {
        'init_embed': xavier_normal(keys[0], (num_ent, init_dim), gain),
        'init_rel': xavier_normal(keys[1], (num_rel * 2, init_dim), gain),
        'conv1': conv_params(keys[2], init_dim, gcn_dim),
        'conv2': conv_params(keys[3], gcn_dim, embed_dim),
        'bias': jnp.zeros((num_ent,), jnp.float32),
    }

    # one-time padding/folding of parameters (hoisted out of the scoring path)
    pparams = prepare_params(params)

    # graph: original edges + inverse edges (edge types offset by num_rel)
    src_o = jax.random.randint(keys[4], (n_orig_edges,), 0, num_ent)
    dst_o = jax.random.randint(keys[5], (n_orig_edges,), 0, num_ent)
    et_o = jax.random.randint(keys[6], (n_orig_edges,), 0, num_rel)
    src = jnp.concatenate([src_o, dst_o])
    dst = jnp.concatenate([dst_o, src_o])
    edge_type = jnp.concatenate([et_o, et_o + num_rel])
    # edge_norm = 1 / in-degree of destination node
    deg = jnp.zeros((num_ent,), jnp.float32).at[dst].add(1.0)
    edge_norm = 1.0 / deg[dst]
    graph = (src, dst, edge_type, edge_norm)

    subj = jax.random.randint(keys[7], (batch,), 0, num_ent)
    rel_idx = jax.random.randint(keys[8], (batch,), 0, num_rel * 2)

    score = compgcn_distmult_forward(pparams, graph, subj, rel_idx, num_ent)
    score = jax.block_until_ready(score)
    assert score.shape == (batch, num_ent)
    assert bool(jnp.all(jnp.isfinite(score)))
    print("KERNEL_OK")
</pallas_src>

<mosaic_0001>
module attributes {stable_mosaic.version = 11 : i64} {
  func.func @_edge_msg_kernel(%arg0: i32, %arg1: i32, %arg2: memref<1x64x128xbf16, #tpu.memory_space<vmem>>, %arg3: memref<1x64x128xbf16, #tpu.memory_space<vmem>>, %arg4: memref<1x64x1xf32, #tpu.memory_space<vmem>>, %arg5: memref<1x128x128xbf16, #tpu.memory_space<vmem>>, %arg6: memref<1x64x128xf32, #tpu.memory_space<vmem>>) attributes {dimension_semantics = [#tpu.dimension_semantics<parallel>, #tpu.dimension_semantics<parallel>], iteration_bounds = array<i64: 2, 1>, scalar_prefetch = 0 : i64, scratch_operands = 0 : i64, tpu.core_type = #tpu.core_type<tc>, window_params = [{transform_indices = @transform_0, window_bounds = array<i64: 1, 64, 128>}, {transform_indices = @transform_1, window_bounds = array<i64: 1, 64, 128>}, {transform_indices = @transform_2, window_bounds = array<i64: 1, 64, 1>}, {transform_indices = @transform_3, window_bounds = array<i64: 1, 128, 128>}, {transform_indices = @transform_4, window_bounds = array<i64: 1, 64, 128>}]} {
    %c0 = arith.constant 0 : index
    %c0_0 = arith.constant 0 : index
    %c0_1 = arith.constant 0 : index
    %0 = vector.load %arg2[%c0, %c0_0, %c0_1] : memref<1x64x128xbf16, #tpu.memory_space<vmem>>, vector<1x64x128xbf16>
    %1 = vector.shape_cast %0 : vector<1x64x128xbf16> to vector<64x128xbf16>
    %c0_2 = arith.constant 0 : index
    %c0_3 = arith.constant 0 : index
    %c0_4 = arith.constant 0 : index
    %2 = vector.load %arg3[%c0_2, %c0_3, %c0_4] : memref<1x64x128xbf16, #tpu.memory_space<vmem>>, vector<1x64x128xbf16>
    %3 = vector.shape_cast %2 : vector<1x64x128xbf16> to vector<64x128xbf16>
    %4 = arith.mulf %1, %3 : vector<64x128xbf16>
    %c0_5 = arith.constant 0 : index
    %c0_6 = arith.constant 0 : index
    %c0_7 = arith.constant 0 : index
    %5 = vector.load %arg5[%c0_5, %c0_6, %c0_7] : memref<1x128x128xbf16, #tpu.memory_space<vmem>>, vector<1x128x128xbf16>
    %6 = vector.shape_cast %5 : vector<1x128x128xbf16> to vector<128x128xbf16>
    %cst = arith.constant dense<0.000000e+00> : vector<64x128xf32>
    %7 = tpu.matmul %4, %6, %cst {dimension_numbers = #tpu.dot_dimension_numbers<[1], [0], [0], [1], [0, 0, 1, 1], [], []>} : vector<64x128xbf16>, vector<128x128xbf16>, vector<64x128xf32> -> vector<64x128xf32>
    %c0_8 = arith.constant 0 : index
    %c0_9 = arith.constant 0 : index
    %c0_10 = arith.constant 0 : index
    %8 = vector.load %arg4[%c0_8, %c0_9, %c0_10] : memref<1x64x1xf32, #tpu.memory_space<vmem>>, vector<1x64x1xf32>
    %9 = vector.shape_cast %8 : vector<1x64x1xf32> to vector<64x1xf32>
    %cst_11 = arith.constant 0.333333343 : f32
    %10 = vector.broadcast %cst_11 : f32 to vector<64x1xf32>
    %11 = arith.mulf %9, %10 : vector<64x1xf32>
    %12 = vector.broadcast %11 : vector<64x1xf32> to vector<64x128xf32>
    %13 = arith.mulf %7, %12 : vector<64x128xf32>
    %c0_12 = arith.constant 0 : index
    %c0_13 = arith.constant 0 : index
    %c0_14 = arith.constant 0 : index
    %14 = vector.load %arg6[%c0_12, %c0_13, %c0_14] : memref<1x64x128xf32, #tpu.memory_space<vmem>>, vector<1x64x128xf32>
    %15 = vector.shape_cast %14 : vector<1x64x128xf32> to vector<64x128xf32>
    %16 = vector.shape_cast %13 : vector<64x128xf32> to vector<1x64x128xf32>
    tpu.vector_store %arg6[%c0_12, %c0_13, %c0_14], %16 {strides = array<i32>} : memref<1x64x128xf32, #tpu.memory_space<vmem>>, vector<1x64x128xf32>,
    return
  }
  func.func @transform_0(%arg0: i32, %arg1: i32) -> (i32, i32, i32) {
    %c0_i32 = arith.constant 0 : i32
    %c0_i32_0 = arith.constant 0 : i32
    return %arg0, %arg1, %c0_i32 : i32, i32, i32
  }
  func.func @transform_1(%arg0: i32, %arg1: i32) -> (i32, i32, i32) {
    %c0_i32 = arith.constant 0 : i32
    %c0_i32_0 = arith.constant 0 : i32
    return %arg0, %arg1, %c0_i32 : i32, i32, i32
  }
  func.func @transform_2(%arg0: i32, %arg1: i32) -> (i32, i32, i32) {
    %c0_i32 = arith.constant 0 : i32
    %c0_i32_0 = arith.constant 0 : i32
    return %arg0, %arg1, %c0_i32 : i32, i32, i32
  }
  func.func @transform_3(%arg0: i32, %arg1: i32) -> (i32, i32, i32) {
    %c0_i32 = arith.constant 0 : i32
    %c0_i32_0 = arith.constant 0 : i32
    %c0_i32_1 = arith.constant 0 : i32
    return %arg0, %c0_i32, %c0_i32_0 : i32, i32, i32
  }
  func.func @transform_4(%arg0: i32, %arg1: i32) -> (i32, i32, i32) {
    %c0_i32 = arith.constant 0 : i32
    %c0_i32_0 = arith.constant 0 : i32
    return %arg0, %arg1, %c0_i32 : i32, i32, i32
  }
}

</mosaic_0001>

<bundles_post_ra>
// kernel: tpu_custom_call.1
= control target key start
LH: loop header
LB: loop body
LE: loop exit
PB: predicated region body
PF: predicated region fallthrough
CT: control target
= control target key end

     0   :  { %9 = vsyncpa [#allocation3], 0  ;;  %s1386_s0 = inlined_call_operand.hbm [shape: bf16[2,64,128], index: 0, kind: input, shape index: {}]   ;;  %s1387_s1 = inlined_call_operand.hbm [shape: bf16[2,64,128], index: 1, kind: input, shape index: {}]   ;;  %s1388_s2 = inlined_call_operand.vmem [shape: f32[2,64,1], index: 2, kind: input, shape index: {}]   ;;  %s1389_s3 = inlined_call_operand.vmem [shape: bf16[2,128,128], index: 3, kind: input, shape index: {}]   ;;  %s1390_s4 = inlined_call_operand.hbm [shape: f32[2,64,128], index: 4, kind: output, shape index: {}]  }
   0x1   :  { %11 = vsyncpa [#allocation3 + $0x1], 0 }
   0x2   :  { %12 = vsyncpa [#allocation6], 0 }
   0x3   :  { %14 = vsyncpa [#allocation6 + $0x1], 0 }
   0x4   :  { %15 = vsyncpa [#allocation4], 0 }
   0x5   :  { %17 = vsyncpa [#allocation4 + $0x1], 0  ;;  %s1101_s15 = smov 0   ;;  %s1103_s16 = smov 0  }
   0x6   :  { %s1105_s17 = smov 0   ;;  %s1107_s18 = smov 0  }
   0x7   :  { %s1109_s19 = smov 0   ;;  %s1111_s20 = smov 0  }
   0x8 LB: > { %s746_s21 = sadd.s32 4294967295, %s1066_s20   ;;  %s747_s22 = sadd.s32 4294967294, %s1066_s20   ;;  %s1066_s20 = sphi %s1111_s20, %s23_s20   ;;  %s1062_s19 = sphi %s1109_s19, %s1410_s19   ;;  %s1058_s18 = sphi %s1107_s18, %s1409_s18   ;;  %s1054_s17 = sphi %s1105_s17, %s1408_s17   ;;  %s1050_s16 = sphi %s1103_s16, %s1407_s16   ;;  %s1046_s15 = sphi %s1101_s15, %s1406_s15  }
   0x9   : > { %s35_s23 = sadd.s32 1, %s1062_s19  ;;  %s44_s24 = sadd.s32 1, %s1054_s17 }
   0xa   : > { %p37_p0 = scmp.ge.s32.totalorder %s35_s23, 2  ;;  %p51_p1 = scmp.ne.s32.totalorder %s1054_s17, %s1050_s16 }
   0xb   : > { %p52_p2 = scmp.eq.s32.totalorder %s1066_s20, 0  ;;  %p57_p3 = scmp.ne.s32.totalorder %s1050_s16, %s1046_s15 }
   0xc   : > { %s1412_s23 = smov (%p37_p0, %s35_s23), 0  ;;  %p58_p5 = scmp.eq.s32.totalorder %s746_s21, 0 }
   0xd   : > { %p1142_p4 = por %p52_p2, %p51_p1  ;;  %s39_s26 = ssub.s32 %s1062_s19, %s1412_s23 }
   0xe   : > { %p165_p6 = scmp.eq.s32.totalorder %s746_s21, 1  ;;  %p42_p7 = scmp.eq.s32.totalorder %s39_s26, 0 }
   0xf   : > { %p1148_p8 = por %p58_p5, %p57_p3  ;;  %p171_p10 = scmp.eq.s32.totalorder %s747_s22, 1 }
  0x10   : > { %p1152_p9 = por %p165_p6, %p51_p1  ;;  %p855_p13 = scmp.lt.s32.totalorder %s1066_s20, 2 }
  0x11   : > { %s1395_s27 = scalar_select %p1148_p8, 1, 0 }
  0x12   : > { %s1396_s28 = scalar_select %p1152_p9, 1, 0 }
  0x13   : > { %s1157_s29 = scalar_select %p42_p7, %s1054_s17, %s44_s24  }
  0x14   : > { %p1159_p11 = por %p171_p10, %p57_p3  ;;  %s1166_s5 = sand.u32 1, %s1054_s17  }
  0x15   : > { %s750_s6 = sshll.u32 %s1166_s5, 5  ;;  %s781_s7 = sshll.u32 %s1062_s19, 9 }
  0x16   : > { %s1397_s30 = scalar_select %p1159_p11, 1, 0 }
  0x17   : > { %s1175_s10 = scalar_lea.hbm %s1386_s0, %s781_s7  ;;  %s195_s11 = scalar_lea.vmem [#allocation2], %s750_s6 }
  0x18   : > { %s204_s12 = sshll.u32 %s195_s11, 4  ;;  %p1183_p0 = pnand %p855_p13, %p1142_p4  ;;  %s1179_s12 = int_to_ptr.vmem [resolvable:$true] %s204_s12 }
  0x19   : > { %s192_s14 = scalar_lea.sflag [#allocation3], %s1166_s5  ;;  %s920_s21 = scalar_lea.hbm %s1175_s10, 512 }
  0x1a   : > { %p921_p2 = scmp.ne.s32.totalorder %s1175_s10, %s920_s21  ;;  %p922_p3 = pneg %p1183_p0 }
  0x1b   : > { %s925_s25 = scalar_lea.hbm %s1386_s0, 1024  ;;  %p926_p4 = scmp.lt.u32.totalorder %s1175_s10, %s1386_s0 }
  0x1c   : > { %p923_p5 = pnand %p922_p3, %p921_p2  ;;  %p927_p7 = scmp.lt.u32.totalorder %s925_s25, %s920_s21 }
  0x1d   : > { %p929_p13 = scmp.lt.u32.totalorder %s920_s21, %s1175_s10 }
  0x1e   : > { %p924_p6 = pneg %p923_p5  ;;  %p928_p10 = por %p927_p7, %p926_p4 }
  0x20   : > { %p930_p12 = por %p929_p13, %p928_p10 }
  0x22   : > { %p931_p1 = pnand %p930_p12, %p924_p6 }
  0x24   : > { %934 = shalt.err (!%p931_p1)
}
  0x25   : > { %s935_s9 = scalar_lea.vmem %s1179_s12, 512  ;;  %s1068_s11 = smov [#allocation2]  }
  0x26   : > { %p936_p2 = scmp.ne.s32.totalorder %s1179_s12, %s935_s9  ;;  %s940_s22 = sshll.u32 %s1068_s11, 4  ;;  %s941_s22 = int_to_ptr.vmem [resolvable:$false] %s940_s22 }
  0x27   : > { %s942_s24 = scalar_lea.vmem %s941_s22, 1024  ;;  %p943_p9 = scmp.lt.s32.totalorder %s1179_s12, %s941_s22 }
  0x28   : > { %p938_p5 = pnand %p936_p2, %p922_p3  ;;  %p944_p4 = scmp.lt.s32.totalorder %s942_s24, %s935_s9 }
  0x2a   : > { %p939_p11 = pneg %p938_p5  ;;  %p945_p7 = por %p944_p4, %p943_p9 }
  0x2c   : > { %p946_p10 = pnand %p945_p7, %p939_p11 }
  0x2e   : > { %949 = shalt.err (!%p946_p10)
}
  0x2f   : > { %s1392_s21 = smov 64   ;;  %s1070_s25 = smov 4  }
  0x30   : > { %847 = dma.hbm_to_vmem [thread:$0]  (!%p1183_p0), %s1175_s10, 512, %s1179_s12, %s192_s14, %s1392_s21, %s1392_s21, %s1070_s25  }
  0x31   : > { %p256_p9 = scmp.lt.s32.totalorder %s1066_s20, 3  ;;  %s1225_s9 = scalar_lea.hbm %s1387_s1, %s781_s7 }
  0x32   : > { %p1399_p11 = scmp.ge.s32.totalorder %s1066_s20, 1  ;;  %s218_s22 = scalar_lea.vmem [#allocation5], %s750_s6 }
  0x33   : > { %s227_s24 = sshll.u32 %s218_s22, 4  ;;  %s215_s10 = scalar_lea.sflag [#allocation6], %s1166_s5  ;;  %s1235_s24 = int_to_ptr.vmem [resolvable:$true] %s227_s24 }
  0x34   : > { %p1229_p12 = pnand %p1399_p11, %p256_p9  ;;  %s950_s12 = scalar_lea.hbm %s1225_s9, 512 }
  0x35   : > { %p951_p1 = scmp.ne.s32.totalorder %s1225_s9, %s950_s12  ;;  %s955_s26 = scalar_lea.hbm %s1387_s1, 1024 }
  0x36   : > { %p956_p2 = scmp.lt.u32.totalorder %s1225_s9, %s1387_s1  ;;  %p957_p5 = scmp.lt.u32.totalorder %s955_s26, %s950_s12 }
  0x37   : > { %p953_p6 = pnand %p951_p1, %p922_p3  ;;  %p959_p7 = scmp.lt.u32.totalorder %s950_s12, %s1225_s9 }
  0x38   : > { %p958_p4 = por %p957_p5, %p956_p2 }
  0x39   : > { %p954_p13 = pneg %p953_p6 }
  0x3a   : > { %p960_p10 = por %p959_p7, %p958_p4 }
  0x3c   : > { %p961_p9 = pnand %p960_p10, %p954_p13 }
  0x3e   : > { %964 = shalt.err (!%p961_p9)
}
  0x3f   : > { %s965_s6 = scalar_lea.vmem %s1235_s24, 512  ;;  %s1071_s22 = smov [#allocation5]  }
  0x40   : > { %p966_p11 = scmp.ne.s32.totalorder %s1235_s24, %s965_s6  ;;  %s970_s7 = sshll.u32 %s1071_s22, 4  ;;  %s971_s7 = int_to_ptr.vmem [resolvable:$false] %s970_s7 }
  0x41   : > { %s972_s21 = scalar_lea.vmem %s971_s7, 1024  ;;  %p973_p8 = scmp.lt.s32.totalorder %s1235_s24, %s971_s7 }
  0x42   : > { %p968_p1 = pnand %p966_p11, %p922_p3  ;;  %p974_p2 = scmp.lt.s32.totalorder %s972_s21, %s965_s6 }
  0x44   : > { %p969_p6 = pneg %p968_p1  ;;  %p975_p5 = por %p974_p2, %p973_p8 }
  0x46   : > { %p976_p4 = pnand %p975_p5, %p969_p6 }
  0x48   : > { %979 = shalt.err (!%p976_p4)
}
  0x49   : > { %s1401_s12 = smov 64   ;;  %260 = sbr.rel (%p1229_p12) target bundleno = 354 (0x162), region = 36 }
  0x4a   : > { %850 = dma.hbm_to_vmem [thread:$0]  (!%p1183_p0), %s1225_s9, 512, %s1235_s24, %s215_s10, %s1401_s12, %s1401_s12, %s1070_s25  }
  0x4b   : > { %s1269_s14 = sand.u32 (!%p1229_p12), 1, %s1050_s16   ;;  %p1402_p8 = scmp.ne.s32.totalorder (!%p1229_p12), %s1395_s27, 0 }
  0x4c   : > { %s757_s26 = sshll.u32 (!%p1229_p12), %s1269_s14, 5  ;;  %s263_s8 = scalar_lea.sflag (!%p1229_p12), [#allocation3], %s1269_s14 }
  0x4d   : > { %s1273_s13 = scalar_lea.vmem (!%p1229_p12), [#allocation2], %s757_s26 }
  0x50   : > { %1033 = dma.done.wait (%p1402_p8), %s263_s8, 512  }
  0x51   : > { %1035 = vsyncadd (%p1402_p8), %s263_s8, 4294966784  ;;  %s272_s5 = scalar_lea.sflag [#allocation6], %s1269_s14  ;;  %s1280_s25 = scalar_lea.vmem [#allocation5], %s757_s26 }
  0x52   : > { %1037 = dma.done.wait (%p1402_p8), %s272_s5, 512  }
  0x53   : > { %1039 = vsyncadd (%p1402_p8), %s272_s5, 4294966784  ;;  %p322_p0 = scmp.lt.s32.totalorder %s1058_s18, 1  ;;  %v1072_v0 = vmov 0   ;;  %v338_v5 = vld [vmem:[%s1273_s13] sm:$0xf]  ;;  %s759_s21 = sshll.u32 %s1269_s14, 6 }
  0x54   : > { %911 = vset.pattern.permute.xlu1 %v1072_v0  ;;  %910 = vset.pattern.permute.xlu0 %v1072_v0  ;;  %v339_v6 = vld [vmem:[%s1273_s13 + $0x4] sm:$0xf]  ;;  %v346_v7 = vld [vmem:[%s1280_s25] sm:$0xf]  ;;  %v342_v10 = vld [vmem:[%s1273_s13 + $0x10] sm:$0xf] }
  0x55   : > { %s323_s9 = scalar_select %p322_p0, %s1058_s18, 1  ;;  %v347_v8 = vld [vmem:[%s1280_s25 + $0x4] sm:$0xf]  ;;  %v354_v9 = vmul.bf16 %v346_v7, %v338_v5  ;;  %v343_v11 = vld [vmem:[%s1273_s13 + $0x14] sm:$0xf] }
  0x56   : > { %v355_v12 = vmul.bf16 %v347_v8, %v339_v6  ;;  %v350_v13 = vld [vmem:[%s1280_s25 + $0x10] sm:$0xf]  ;;  %v351_v14 = vld [vmem:[%s1280_s25 + $0x14] sm:$0xf]  ;;  %v340_v32 = vld [vmem:[%s1273_s13 + $0x8] sm:$0xf] }
  0x57   : > { %s783_s11 = sshll.u32 %s323_s9, 6  ;;  %v358_v15 = vmul.bf16 %v350_v13, %v342_v10  ;;  %v359_v16 = vmul.bf16 %v351_v14, %v343_v11  ;;  %v348_v33 = vld [vmem:[%s1280_s25 + $0x8] sm:$0xf]  ;;  %v341_v34 = vld [vmem:[%s1273_s13 + $0xc] sm:$0xf]  ;;  %s318_s12 = scalar_lea.vmem [#allocation7], %s759_s21 }
  0x58   : > { %s1291_s6 = scalar_lea.vmem %s1389_s3, %s783_s11  ;;  %s1308_s7 = scalar_lea.vmem %s1388_s2, %s783_s11  ;;  %v764_v18 = vcombine.low %v354_v9, %v355_v12  ;;  %v349_v35 = vld [vmem:[%s1280_s25 + $0xc] sm:$0xf]  ;;  %v344_v36 = vld [vmem:[%s1273_s13 + $0x18] sm:$0xf]  ;;  %v345_v38 = vld [vmem:[%s1273_s13 + $0x1c] sm:$0xf]  ;;  %v356_v45 = vmul.bf16 %v348_v33, %v340_v32 }
  0x59   : > { %v912_v1 = vld [vmem:[%s1291_s6] sm:$0xff]   ;;  %v913_v2 = vld [vmem:[%s1291_s6 + $0x8] sm:$0xff]   ;;  %v914_v3 = vld [vmem:[%s1291_s6 + $0x10] sm:$0xff]   ;;  %v766_v19 = vcombine.low %v358_v15, %v359_v16  ;;  %v357_v47 = vmul.bf16 %v349_v35, %v341_v34  ;;  %s603_s26 = sshll.u32 %s318_s12, 4  ;;  %s785_s8 = sshll.u32 %s1058_s18, 10  ;;  %s1332_s26 = int_to_ptr.vmem [resolvable:$true] %s603_s26 }
  0x5a   : > { %798 = vmatprep.subr.bf16.mxu0 %v912_v1  ;;  %822 = vmatprep.subr.bf16.mxu1 %v912_v1  ;;  %v915_v4 = vld [vmem:[%s1291_s6 + $0x18] sm:$0xff]   ;;  %v916_v17 = vld [vmem:[%s1291_s6 + $0x20] sm:$0xff]   ;;  %v517_v20 = vld [vmem:[%s1308_s7 + $0x10] sm:$0xff]  ;;  %s1337_s5 = scalar_lea.hbm %s1390_s4, %s785_s8  ;;  %s980_s9 = scalar_lea.vmem %s1332_s26, 1024 }
  0x5b   : > { %799 = vmatpush3.bf16.msra.mxu0 %v912_v1  ;;  %830 = vmatpush3.bf16.msra.mxu1 %v912_v1  ;;  %v515_v21 = vld [vmem:[%s1308_s7] sm:$0xff]  ;;  %v525_v22 = vmul.f32 0.33333334, %v517_v20  ;;  %v518_v24 = vld [vmem:[%s1308_s7 + $0x18] sm:$0xff]  ;;  %v516_v25 = vld [vmem:[%s1308_s7 + $0x8] sm:$0xff]  ;;  %v765_v51 = vcombine.low %v356_v45, %v357_v47  ;;  %p981_p3 = scmp.ne.s32.totalorder %s1332_s26, %s980_s9  ;;  %p1403_p12 = scmp.ne.s32.totalorder %s1396_s28, 0 }
  0x5c   : > { %800 = vmatprep.subr.bf16.mxu0 %v913_v2  ;;  %823 = vmatprep.subr.bf16.mxu1 %v913_v2  ;;  %v523_v23 = vmul.f32 0.33333334, %v515_v21  ;;  %v917_v26 = vld [vmem:[%s1291_s6 + $0x28] sm:$0xff]   ;;  %v526_v27 = vmul.f32 0.33333334, %v518_v24  ;;  %v519_v30 = vld [vmem:[%s1308_s7 + $0x20] sm:$0xff] }
  0x5d   : > { %814 = vmatprep.mubr.bf16.mxu0 %v764_v18  ;;  %818 = vmatprep.mubr.bf16.mxu1 %v766_v19  ;;  %v524_v28 = vmul.f32 0.33333334, %v516_v25  ;;  %v520_v29 = vld [vmem:[%s1308_s7 + $0x28] sm:$0xff]  ;;  %v918_v31 = vld [vmem:[%s1291_s6 + $0x30] sm:$0xff]   ;;  %v527_v39 = vmul.f32 0.33333334, %v519_v30  ;;  %p982_p13 = pnand %p981_p3, %p1403_p12 }
  0x5e   : > { %543 = vperm.xlu1 %911, %v525_v22   ;;  %533 = vperm.xlu0 %910, %v523_v23   ;;  %v528_v37 = vmul.f32 0.33333334, %v520_v29  ;;  %v522_v40 = vld [vmem:[%s1308_s7 + $0x38] sm:$0xff]  ;;  %v521_v43 = vld [vmem:[%s1308_s7 + $0x30] sm:$0xff]  ;;  %s1073_s11 = smov [#allocation7]  }
  0x5f   : > { %801 = vmatpush3.bf16.msra.mxu0 %v913_v2  ;;  %831 = vmatpush3.bf16.msra.mxu1 %v913_v2  ;;  %v352_v41 = vld [vmem:[%s1280_s25 + $0x18] sm:$0xf]  ;;  %v353_v42 = vld [vmem:[%s1280_s25 + $0x1c] sm:$0xf]  ;;  %v530_v46 = vmul.f32 0.33333334, %v522_v40  ;;  %p983_p7 = pneg %p982_p13 }
  0x60   : > { %802 = vmatprep.subr.bf16.mxu0 %v914_v3  ;;  %824 = vmatprep.subr.bf16.mxu1 %v914_v3  ;;  %v919_v44 = vld [vmem:[%s1291_s6 + $0x38] sm:$0xff]   ;;  %v360_v48 = vmul.bf16 %v352_v41, %v344_v36  ;;  %v361_v49 = vmul.bf16 %v353_v42, %v345_v38  ;;  %v529_v50 = vmul.f32 0.33333334, %v521_v43  ;;  %s588_s25 = scalar_lea.sflag [#allocation4], %s1269_s14  ;;  %s984_s24 = sshll.u32 %s1073_s11, 4  ;;  %s985_s24 = int_to_ptr.vmem [resolvable:$false] %s984_s24 }
  0x61   : > { %s986_s10 = scalar_lea.vmem %s985_s24, 2048  ;;  %p987_p10 = scmp.lt.s32.totalorder %s1332_s26, %s985_s24 }
  0x62   : > { %548 = vperm.xlu1 %911, %v526_v27   ;;  %538 = vperm.xlu0 %910, %v524_v28   ;;  %v767_v52 = vcombine.low %v360_v48, %v361_v49  ;;  %p988_p9 = scmp.lt.s32.totalorder %s986_s10, %s980_s9 }
  0x63   : > { %803 = vmatpush3.bf16.msra.mxu0 %v914_v3  ;;  %832 = vmatpush3.bf16.msra.mxu1 %v914_v3 }
  0x64   : > { %804 = vmatprep.subr.bf16.mxu0 %v915_v4  ;;  %825 = vmatprep.subr.bf16.mxu1 %v915_v4  ;;  %p989_p11 = por %p988_p9, %p987_p10 }
  0x66   : > { %558 = vperm.xlu1 %911, %v528_v37   ;;  %553 = vperm.xlu0 %910, %v527_v39   ;;  %p990_p1 = pnand %p989_p11, %p983_p7 }
  0x67   : > { %805 = vmatpush3.bf16.msra.mxu0 %v915_v4  ;;  %833 = vmatpush3.bf16.msra.mxu1 %v915_v4 }
  0x68   : > { %806 = vmatprep.subr.bf16.mxu0 %v916_v17  ;;  %826 = vmatprep.subr.bf16.mxu1 %v916_v17 }
  0x6a   : > { %568 = vperm.xlu1 %911, %v530_v46   ;;  %563 = vperm.xlu0 %910, %v529_v50  }
  0x6b   : > { %807 = vmatpush3.bf16.msra.mxu0 %v916_v17  ;;  %834 = vmatpush3.bf16.msra.mxu1 %v916_v17 }
  0x6c   : > { %808 = vmatprep.subr.bf16.mxu0 %v917_v26  ;;  %827 = vmatprep.subr.bf16.mxu1 %v917_v26 }
  0x6f   : > { %809 = vmatpush3.bf16.msra.mxu0 %v917_v26  ;;  %835 = vmatpush3.bf16.msra.mxu1 %v917_v26 }
  0x70   : > { %810 = vmatprep.subr.bf16.mxu0 %v918_v31  ;;  %828 = vmatprep.subr.bf16.mxu1 %v918_v31 }
  0x73   : > { %811 = vmatpush3.bf16.msra.mxu0 %v918_v31  ;;  %836 = vmatpush3.bf16.msra.mxu1 %v918_v31 }
  0x74   : > { %812 = vmatprep.subr.bf16.mxu0 %v919_v44  ;;  %829 = vmatprep.subr.bf16.mxu1 %v919_v44 }
  0x77   : > { %813 = vmatpush3.bf16.msra.mxu0 %v919_v44  ;;  %837 = vmatpush3.bf16.msra.mxu1 %v919_v44 }
  0x7a   : > { %815 = vmatmul.mubr.bf16.vlgmr.msra.gmra.mrb[0].mxu0 %v765_v51  ;;  %819 = vmatmul.mubr.bf16.vlgmr.msra.gmra.mrb[0].mxu1 %v767_v52 }
  0xdd   : > { %v544_v53 = vpop.permute.xlu1 %543  ;;  %v534_v54 = vpop.permute.xlu0 %533 }
  0xe1   : > { %v549_v55 = vpop.permute.xlu1 %548  ;;  %v539_v56 = vpop.permute.xlu0 %538 }
  0xe5   : > { %v559_v57 = vpop.permute.xlu1 %558  ;;  %v554_v58 = vpop.permute.xlu0 %553 }
  0xe9   : > { %v569_v59 = vpop.permute.xlu1 %568  ;;  %v564_v60 = vpop.permute.xlu0 %563 }
 0x14d   : > { %v816_v61 = vpop.f32.mrb[0].mxu0  ;;  %v820_v62 = vpop.f32.mrb[0].mxu1 }
 0x14e   : > { %v573_v63 = vmul.f32 %v816_v61, %v544_v53  ;;  %v577_v0 = vmul.f32 %v820_v62, %v564_v60  ;;  %v484_v1 = vpop.f32.mrb[1].mxu0  ;;  %v500_v2 = vpop.f32.mrb[1].mxu1 }
 0x14f   : > { %v571_v3 = vmul.f32 %v534_v54, %v484_v1  ;;  %v575_v4 = vmul.f32 %v554_v58, %v500_v2  ;;  %v817_v5 = vpop.f32.mrb[2].mxu0  ;;  %v821_v6 = vpop.f32.mrb[2].mxu1 }
 0x150   : > { %581 = vst [vmem:[%s318_s12 + $0x10] sm:$0xff] %v573_v63  ;;  %585 = vst [vmem:[%s318_s12 + $0x30] sm:$0xff] %v577_v0  ;;  %v574_v7 = vmul.f32 %v817_v5, %v549_v55  ;;  %v578_v8 = vmul.f32 %v821_v6, %v569_v59  ;;  %v487_v9 = vpop.f32.mrb[3].mxu0  ;;  %v503_v10 = vpop.f32.mrb[3].mxu1 }
 0x151   : > { %579 = vst [vmem:[%s318_s12] sm:$0xff] %v571_v3  ;;  %583 = vst [vmem:[%s318_s12 + $0x20] sm:$0xff] %v575_v4  ;;  %v572_v11 = vmul.f32 %v539_v56, %v487_v9  ;;  %v576_v12 = vmul.f32 %v559_v57, %v503_v10 }
 0x152   : > { %582 = vst [vmem:[%s318_s12 + $0x18] sm:$0xff] %v574_v7  ;;  %586 = vst [vmem:[%s318_s12 + $0x38] sm:$0xff] %v578_v8 }
 0x153   : > { %580 = vst [vmem:[%s318_s12 + $0x8] sm:$0xff] %v572_v11  ;;  %584 = vst [vmem:[%s318_s12 + $0x28] sm:$0xff] %v576_v12 }
 0x154   : > { %993 = shalt.err (!%p990_p1)
}
 0x155   : > { %s994_s6 = scalar_lea.hbm %s1337_s5, 1024  ;;  %s998_s7 = scalar_lea.hbm %s1390_s4, 2048 }
 0x156   : > { %p995_p6 = scmp.ne.s32.totalorder %s1337_s5, %s994_s6  ;;  %p999_p4 = scmp.lt.u32.totalorder %s1337_s5, %s1390_s4 }
 0x157   : > { %p1000_p8 = scmp.lt.u32.totalorder %s998_s7, %s994_s6  ;;  %p1002_p3 = scmp.lt.u32.totalorder %s994_s6, %s1337_s5 }
 0x158   : > { %p996_p2 = pnand %p995_p6, %p1403_p12 }
 0x159   : > { %p1001_p0 = por %p1000_p8, %p999_p4 }
 0x15a   : > { %p997_p5 = pneg %p996_p2 }
 0x15b   : > { %p1003_p13 = por %p1002_p3, %p1001_p0 }
 0x15d   : > { %p1004_p7 = pnand %p1003_p13, %p997_p5 }
 0x15f   : > { %1007 = shalt.err (!%p1004_p7)
}
 0x160   : > { %s1074_s8 = smov 128   ;;  %s1075_s18 = smov 8  }
 0x161   : > { %842 = dma.vmem_to_hbm [thread:$0]  (%p1403_p12), %s1332_s26, 1024, %s1337_s5, %s588_s25, %s1074_s8, %s1074_s8, %s1075_s18  }
 0x162 PF: > { %s618_s13 = sand.u32 1, %s1046_s15   ;;  %p1404_p10 = scmp.ne.s32.totalorder %s1397_s30, 0 }
 0x163   : > { %p1405_p9 = scmp.ge.s32.totalorder %s1066_s20, 2  ;;  %s619_s9 = scalar_lea.sflag [#allocation4], %s618_s13 }
 0x165   : > { %p852_p11 = pnand %p1405_p9, %p1404_p10 }
 0x167   : > { %1041 = dma.done.wait (!%p852_p11), %s619_s9, 1024  }
 0x168   : > { %1043 = vsyncadd (!%p852_p11), %s619_s9, 4294966272  ;;  %s23_s20 = sadd.s32 1, %s1066_s20   ;;  %s1406_s15 = smov %s1050_s16 }
 0x169   : > { %p20_p1 = scmp.ge.s32.totalorder %s23_s20, 4   ;;  %s1407_s16 = smov %s1054_s17 }
 0x16a   : > { %s1408_s17 = smov %s1157_s29  ;;  %s1409_s18 = smov %s1062_s19 }
 0x16b   : > { %s1410_s19 = smov %s1412_s23  ;;  %22 = sbr.rel (!%p20_p1) target bundleno = 8 (0x8), region = 100 }
 0x172   :  { %624 = vsyncpa [#allocation3], 1 }
 0x173   :  { %626 = vsyncpa [#allocation3 + $0x1], 1 }
 0x174   :  { %627 = vsyncpa [#allocation6], 1 }
 0x175   :  { %629 = vsyncpa [#allocation6 + $0x1], 1 }
 0x176   :  { %630 = vsyncpa [#allocation4], 1 }
 0x177   :  { %632 = vsyncpa [#allocation4 + $0x1], 1 }

</bundles_post_ra>
